<compile_context>
chip_gen: v7x
topology: tpu7x:2x2x1
jax: 0.10.0
libtpu: 0.0.40
codegen_flags: <defaults>
</compile_context>

<pallas_src>
import functools

import jax
import jax.numpy as jnp
from jax.experimental import pallas as pl
from jax.experimental.pallas import tpu as pltpu


def _rmsnorm_kernel(x_ref, w_ref, o_ref, *, eps: float, partial_size: int,
                    full_sum: bool):
    # x_ref: (tile_rows, dim_p), w_ref: (1, dim_p), o_ref: (tile_rows, dim_p)
    xf = x_ref[...].astype(jnp.float32)

    if full_sum:
        # frac >= 1.0 path.  Any zero-padded lane columns contribute 0 to the
        # sum, so summing the whole (possibly padded) block is exact.
        sum_sq = jnp.sum(xf * xf, axis=-1, keepdims=True)
    elif partial_size % 128 == 0:
        # Lane-aligned static slice: no per-tile mask generation.
        xp = xf[:, :partial_size]
        sum_sq = jnp.sum(xp * xp, axis=-1, keepdims=True)
    else:
        # Unaligned partial statistic: mask with an iota (cheap VPU filler in
        # a mem-bound regime).
        col = jax.lax.broadcasted_iota(jnp.int32, xf.shape, 1)
        xp = jnp.where(col < partial_size, xf, 0.0)
        sum_sq = jnp.sum(xp * xp, axis=-1, keepdims=True)

    rms = jax.lax.rsqrt(sum_sq / float(partial_size) + eps)   # EUP rsqrt

    w = w_ref[...].astype(jnp.float32)                        # (1, dim_p)
    # Re-read x from the (already VMEM-resident) input block so the compiler
    # can rematerialize from the DMA buffer instead of keeping a full-tile f32
    # copy of x live across the row reduction.
    x2 = x_ref[...].astype(jnp.float32)
    o_ref[...] = (x2 * rms * (1.0 + w)).astype(o_ref.dtype)


def _pick_tile_rows(rows: int, dim_p: int, dtype_bytes: int,
                    vmem_budget_bytes: int, tile_rows_hint):
    # Sublane packing: one vreg holds 8 f32 / 16 bf16 / 32 int8 rows.
    align = max(8, 32 // dtype_bytes)
    # Per-row VMEM footprint: double-buffered input + double-buffered output
    # DMA blocks, plus the live f32 working copy inside the kernel body.
    bytes_per_row = dim_p * (2 * dtype_bytes + 2 * dtype_bytes + 4)
    if tile_rows_hint is None:
        tr = vmem_budget_bytes // bytes_per_row
        tr = max(align, (tr // align) * align)
        tr = min(tr, 2048)
    else:
        tr = max(align, (int(tile_rows_hint) // align) * align)
    if rows <= tr:
        # Single block covering the full row extent (allowed even when `rows`
        # is not a multiple of the sublane alignment).
        tr = rows
    return tr


# Cached after the first call: does the installed Mosaic accept CORE_PARALLEL?
_CORE_PARALLEL_OK = None


def rmsnorm(x, weight, *, eps: float = 1e-6, frac: float = 1.0,
            tile_rows: int | None = None,
            vmem_budget_bytes: int = 24 * 1024 * 1024):
    """Pallas RMSNorm over the last axis (dims_to_apply_to=[-1])."""
    # TODO(synk): only dims_to_apply_to=[-1] (the module default) is supported.
    global _CORE_PARALLEL_OK

    orig_shape = x.shape
    dim = orig_shape[-1]
    assert weight.shape == (dim,)

    rows = 1
    for s in orig_shape[:-1]:
        rows *= s

    # Match the PyTorch module: weight.to(x.dtype) before (1 + weight).
    w = weight.astype(x.dtype)

    x2d = x.reshape(rows, dim)
    w2d = w.reshape(1, dim)

    # Lane-dense feature axis: pad to a multiple of 128 so stores are unmasked.
    dim_p = dim if dim % 128 == 0 else ((dim + 127) // 128) * 128
    if dim_p != dim:
        x2d = jnp.pad(x2d, ((0, 0), (0, dim_p - dim)))
        w2d = jnp.pad(w2d, ((0, 0), (0, dim_p - dim)))

    full_sum = frac >= 1.0
    # Guard int(dim * frac) == 0 (would divide by zero).
    partial_size = dim if full_sum else max(1, int(dim * frac))

    dtype_bytes = jnp.dtype(x.dtype).itemsize
    tr = _pick_tile_rows(rows, dim_p, dtype_bytes, vmem_budget_bytes, tile_rows)
    grid = (pl.cdiv(rows, tr),)

    # VMEM limit from the actual footprint: double-buffered in + out blocks,
    # the f32 working copy, the resident weight block, plus slack.  Floor at
    # 16 MiB (v5e's default scoped limit), ceiling well inside v7x's 64 MiB.
    tile_bytes = tr * dim_p * (2 * dtype_bytes + 2 * dtype_bytes + 4)
    vmem_limit = tile_bytes + 2 * dim_p * dtype_bytes + (2 << 20)
    vmem_limit = min(max(vmem_limit, 16 << 20), 64 << 20)

    # Advisory cost estimate (mem-bound: 2 passes over x plus the weight).
    cost = pl.CostEstimate(
        flops=3 * rows * dim_p,
        transcendentals=rows,
        bytes_accessed=2 * rows * dim_p * dtype_bytes + dim_p * dtype_bytes,
    )

    kernel = functools.partial(_rmsnorm_kernel, eps=eps,
                               partial_size=partial_size, full_sum=full_sum)

    def run(row_semantics):
        return pl.pallas_call(
            kernel,
            out_shape=jax.ShapeDtypeStruct((rows, dim_p), x.dtype),
            grid_spec=pl.GridSpec(
                grid=grid,
                in_specs=[
                    pl.BlockSpec((tr, dim_p), lambda i: (i, 0)),   # x tile
                    pl.BlockSpec((1, dim_p), lambda i: (0, 0)),    # weight (resident)
                ],
                out_specs=pl.BlockSpec((tr, dim_p), lambda i: (i, 0)),
            ),
            compiler_params=pltpu.CompilerParams(
                dimension_semantics=(row_semantics,),
                vmem_limit_bytes=int(vmem_limit),
            ),
            cost_estimate=cost,
        )(x2d, w2d)

    if _CORE_PARALLEL_OK is None:
        # Probe once: CORE_PARALLEL shards the row loop across v7x's 2 TCs
        # (the single biggest lever for this HBM-bound kernel); harmless on
        # single-TC chips.  Fall back to "parallel" if lowering rejects it.
        try:
            out2d = jax.block_until_ready(run(pltpu.CORE_PARALLEL))
            _CORE_PARALLEL_OK = True
        except Exception:
            _CORE_PARALLEL_OK = False
            out2d = run("parallel")
    elif _CORE_PARALLEL_OK:
        out2d = run(pltpu.CORE_PARALLEL)
    else:
        out2d = run("parallel")

    if dim_p != dim:
        out2d = out2d[:, :dim]
    return out2d.reshape(orig_shape)


def rmsnorm_ref(x, weight, *, eps=1e-6, frac=1.0):
    """Pure-JAX reference mirroring the PyTorch forward."""
    dim = x.shape[-1]
    if frac < 1.0:
        p = max(1, int(dim * frac))
        ms = jnp.mean(x[..., :p] ** 2, axis=-1, keepdims=True)
    else:
        ms = jnp.mean(x ** 2, axis=-1, keepdims=True)
    rms = jax.lax.rsqrt(ms + eps)
    return x * rms * (1.0 + weight.astype(x.dtype))


if __name__ == "__main__":
    key = jax.random.PRNGKey(0)
    batch, seq, hidden = 2, 8, 32

    kx, kw, kx2 = jax.random.split(key, 3)
    x = jax.random.normal(kx, (batch, seq, hidden), dtype=jnp.float32)
    # Module init is ones; perturb slightly (deterministically) so the
    # (1 + weight) path is actually exercised.
    weight = jnp.ones((hidden,), jnp.float32) + 0.01 * jax.random.normal(
        kw, (hidden,), dtype=jnp.float32)

    # frac = 1.0 path (dim=32 -> padded to a lane-dense 128 and sliced back).
    out = jax.block_until_ready(rmsnorm(x, weight, eps=1e-6, frac=1.0))
    ref = rmsnorm_ref(x, weight, eps=1e-6, frac=1.0)
    assert out.shape == x.shape and out.dtype == x.dtype
    assert jnp.allclose(out, ref, atol=1e-5, rtol=1e-5)

    # frac < 1.0 path (partial_size = 16, unaligned -> masked statistic).
    out_frac = jax.block_until_ready(rmsnorm(x, weight, eps=1e-6, frac=0.5))
    ref_frac = rmsnorm_ref(x, weight, eps=1e-6, frac=0.5)
    assert jnp.allclose(out_frac, ref_frac, atol=1e-5, rtol=1e-5)

    # Ragged-tail path: rows=20 with an explicit 8-row tile -> grid of 3 with a
    # partial trailing block (exercises cdiv / masked-tail handling).
    x_rag = jax.random.normal(kx2, (5, 4, hidden), dtype=jnp.float32)
    out_rag = jax.block_until_ready(
        rmsnorm(x_rag, weight, eps=1e-6, frac=1.0, tile_rows=8))
    ref_rag = rmsnorm_ref(x_rag, weight, eps=1e-6, frac=1.0)
    assert jnp.allclose(out_rag, ref_rag, atol=1e-5, rtol=1e-5)

    # bf16 path (exercises the in-kernel f32 upcast / re-read and the
    # weight-to-x.dtype cast); compare against an f32 reference with
    # bf16-appropriate tolerances.
    x_bf16 = x.astype(jnp.bfloat16)
    out_bf16 = jax.block_until_ready(rmsnorm(x_bf16, weight, eps=1e-6, frac=1.0))
    ref_bf16 = rmsnorm_ref(x_bf16.astype(jnp.float32), weight, eps=1e-6, frac=1.0)
    assert out_bf16.dtype == jnp.bfloat16
    assert jnp.allclose(out_bf16.astype(jnp.float32), ref_bf16,
                        atol=5e-2, rtol=5e-2)

    print("KERNEL_OK")
</pallas_src>

<mosaic_0001>
module attributes {stable_mosaic.version = 11 : i64} {
  func.func @_rmsnorm_kernel(%arg0: i32, %arg1: memref<16x128xf32, #tpu.memory_space<vmem>>, %arg2: memref<1x128xf32, #tpu.memory_space<vmem>>, %arg3: memref<16x128xf32, #tpu.memory_space<vmem>>) attributes {dimension_semantics = [#tpu.dimension_semantics<core_parallel>], iteration_bounds = array<i64: 1>, scalar_prefetch = 0 : i64, scratch_operands = 0 : i64, tpu.core_type = #tpu.core_type<tc>, window_params = [{transform_indices = @transform_0, window_bounds = array<i64: 16, 128>}, {pipeline_mode = #tpu.pipeline_mode<synchronous>, transform_indices = @transform_1, window_bounds = array<i64: 1, 128>}, {transform_indices = @transform_2, window_bounds = array<i64: 16, 128>}]} {
    %c0 = arith.constant 0 : index
    %c0_0 = arith.constant 0 : index
    %0 = vector.load %arg1[%c0, %c0_0] : memref<16x128xf32, #tpu.memory_space<vmem>>, vector<16x128xf32>
    %1 = arith.mulf %0, %0 : vector<16x128xf32>
    %cst = arith.constant dense<0.000000e+00> : vector<16xf32>
    %2 = vector.multi_reduction <add>, %1, %cst [1] : vector<16x128xf32> to vector<16xf32>
    %3 = vector.shape_cast %2 : vector<16xf32> to vector<16x1xf32>
    %cst_1 = arith.constant 3.200000e+01 : f32
    %4 = vector.broadcast %cst_1 : f32 to vector<16x1xf32>
    %5 = arith.divf %3, %4 : vector<16x1xf32>
    %cst_2 = arith.constant 9.99999997E-7 : f32
    %6 = vector.broadcast %cst_2 : f32 to vector<16x1xf32>
    %7 = arith.addf %5, %6 : vector<16x1xf32>
    %8 = math.rsqrt %7 : vector<16x1xf32>
    %c0_3 = arith.constant 0 : index
    %c0_4 = arith.constant 0 : index
    %9 = vector.load %arg2[%c0_3, %c0_4] : memref<1x128xf32, #tpu.memory_space<vmem>>, vector<1x128xf32>
    %c0_5 = arith.constant 0 : index
    %c0_6 = arith.constant 0 : index
    %10 = vector.load %arg1[%c0_5, %c0_6] : memref<16x128xf32, #tpu.memory_space<vmem>>, vector<16x128xf32>
    %11 = vector.broadcast %8 : vector<16x1xf32> to vector<16x128xf32>
    %12 = arith.mulf %10, %11 : vector<16x128xf32>
    %cst_7 = arith.constant 1.000000e+00 : f32
    %13 = vector.broadcast %cst_7 : f32 to vector<1x128xf32>
    %14 = arith.addf %13, %9 : vector<1x128xf32>
    %15 = vector.broadcast %14 : vector<1x128xf32> to vector<16x128xf32>
    %16 = arith.mulf %12, %15 : vector<16x128xf32>
    %c0_8 = arith.constant 0 : index
    %c0_9 = arith.constant 0 : index
    %17 = vector.load %arg3[%c0_8, %c0_9] : memref<16x128xf32, #tpu.memory_space<vmem>>, vector<16x128xf32>
    tpu.vector_store %arg3[%c0_8, %c0_9], %16 {strides = array<i32>} : memref<16x128xf32, #tpu.memory_space<vmem>>, vector<16x128xf32>,
    return
  }
  func.func @transform_0(%arg0: i32) -> (i32, i32) {
    %c0_i32 = arith.constant 0 : i32
    %c0_i32_0 = arith.constant 0 : i32
    return %arg0, %c0_i32 : i32, i32
  }
  func.func @transform_1(%arg0: i32) -> (i32, i32) {
    %c0_i32 = arith.constant 0 : i32
    %c0_i32_0 = arith.constant 0 : i32
    %c0_i32_1 = arith.constant 0 : i32
    return %c0_i32, %c0_i32_0 : i32, i32
  }
  func.func @transform_2(%arg0: i32) -> (i32, i32) {
    %c0_i32 = arith.constant 0 : i32
    %c0_i32_0 = arith.constant 0 : i32
    return %arg0, %c0_i32 : i32, i32
  }
}

module attributes {stable_mosaic.version = 11 : i64} {
  func.func @_rmsnorm_kernel(%arg0: i32, %arg1: memref<16x128xf32, #tpu.memory_space<vmem>>, %arg2: memref<1x128xf32, #tpu.memory_space<vmem>>, %arg3: memref<16x128xf32, #tpu.memory_space<vmem>>) attributes {dimension_semantics = [#tpu.dimension_semantics<parallel>], iteration_bounds = array<i64: 1>, scalar_prefetch = 0 : i64, scratch_operands = 0 : i64, tpu.core_type = #tpu.core_type<tc>, window_params = [{transform_indices = @transform_0, window_bounds = array<i64: 16, 128>}, {pipeline_mode = #tpu.pipeline_mode<synchronous>, transform_indices = @transform_1, window_bounds = array<i64: 1, 128>}, {transform_indices = @transform_2, window_bounds = array<i64: 16, 128>}]} {
    %c0 = arith.constant 0 : index
    %c0_0 = arith.constant 0 : index
    %0 = vector.load %arg1[%c0, %c0_0] : memref<16x128xf32, #tpu.memory_space<vmem>>, vector<16x128xf32>
    %1 = arith.mulf %0, %0 : vector<16x128xf32>
    %cst = arith.constant dense<0.000000e+00> : vector<16xf32>
    %2 = vector.multi_reduction <add>, %1, %cst [1] : vector<16x128xf32> to vector<16xf32>
    %3 = vector.shape_cast %2 : vector<16xf32> to vector<16x1xf32>
    %cst_1 = arith.constant 3.200000e+01 : f32
    %4 = vector.broadcast %cst_1 : f32 to vector<16x1xf32>
    %5 = arith.divf %3, %4 : vector<16x1xf32>
    %cst_2 = arith.constant 9.99999997E-7 : f32
    %6 = vector.broadcast %cst_2 : f32 to vector<16x1xf32>
    %7 = arith.addf %5, %6 : vector<16x1xf32>
    %8 = math.rsqrt %7 : vector<16x1xf32>
    %c0_3 = arith.constant 0 : index
    %c0_4 = arith.constant 0 : index
    %9 = vector.load %arg2[%c0_3, %c0_4] : memref<1x128xf32, #tpu.memory_space<vmem>>, vector<1x128xf32>
    %c0_5 = arith.constant 0 : index
    %c0_6 = arith.constant 0 : index
    %10 = vector.load %arg1[%c0_5, %c0_6] : memref<16x128xf32, #tpu.memory_space<vmem>>, vector<16x128xf32>
    %11 = vector.broadcast %8 : vector<16x1xf32> to vector<16x128xf32>
    %12 = arith.mulf %10, %11 : vector<16x128xf32>
    %cst_7 = arith.constant 1.000000e+00 : f32
    %13 = vector.broadcast %cst_7 : f32 to vector<1x128xf32>
    %14 = arith.addf %13, %9 : vector<1x128xf32>
    %15 = vector.broadcast %14 : vector<1x128xf32> to vector<16x128xf32>
    %16 = arith.mulf %12, %15 : vector<16x128xf32>
    %c0_8 = arith.constant 0 : index
    %c0_9 = arith.constant 0 : index
    %17 = vector.load %arg3[%c0_8, %c0_9] : memref<16x128xf32, #tpu.memory_space<vmem>>, vector<16x128xf32>
    tpu.vector_store %arg3[%c0_8, %c0_9], %16 {strides = array<i32>} : memref<16x128xf32, #tpu.memory_space<vmem>>, vector<16x128xf32>,
    return
  }
  func.func @transform_0(%arg0: i32) -> (i32, i32) {
    %c0_i32 = arith.constant 0 : i32
    %c0_i32_0 = arith.constant 0 : i32
    return %arg0, %c0_i32 : i32, i32
  }
  func.func @transform_1(%arg0: i32) -> (i32, i32) {
    %c0_i32 = arith.constant 0 : i32
    %c0_i32_0 = arith.constant 0 : i32
    %c0_i32_1 = arith.constant 0 : i32
    return %c0_i32, %c0_i32_0 : i32, i32
  }
  func.func @transform_2(%arg0: i32) -> (i32, i32) {
    %c0_i32 = arith.constant 0 : i32
    %c0_i32_0 = arith.constant 0 : i32
    return %arg0, %c0_i32 : i32, i32
  }
}

</mosaic_0001>

<bundles_post_ra>
// kernel: tpu_custom_call.1
= control target key start
LH: loop header
LB: loop body
LE: loop exit
PB: predicated region body
PF: predicated region fallthrough
CT: control target
= control target key end

     0   :  { %s169_s9 = sld [smem:[#allocation0]]   ;;  %s203_s0 = inlined_call_operand.hbm [shape: f32[16,128], index: 0, kind: input, shape index: {}]   ;;  %s204_s1 = inlined_call_operand.vmem [shape: f32[1,128], index: 1, kind: input, shape index: {}]   ;;  %s205_s2 = inlined_call_operand.hbm [shape: f32[16,128], index: 2, kind: output, shape index: {}]  }
   0x1   :  { %7 = vsyncpa [#allocation3], 0 }
   0x2   :  { %8 = vsyncpa [#allocation4], 0  ;;  %s150_s14 = smov [#allocation2]   ;;  %s100_s19 = scalar_lea.hbm %s203_s0, 256 }
   0x3   :  { %s17_s15 = sshll.u32 %s150_s14, 4  ;;  %s18_s15 = int_to_ptr.vmem [resolvable:$true] %s17_s15 }
   0x6   :  { %s88_s10 = sshll.u32 %s169_s9, 8 }
   0x7   :  { %s16_s13 = scalar_lea.hbm %s203_s0, %s88_s10 }
   0x8   :  { %s98_s16 = scalar_lea.hbm %s16_s13, 256  ;;  %p101_p1 = scmp.lt.u32.totalorder %s16_s13, %s203_s0 }
   0x9   :  { %p99_p0 = scmp.ne.s32.totalorder %s16_s13, %s98_s16  ;;  %p102_p2 = scmp.lt.u32.totalorder %s100_s19, %s98_s16 }
   0xa   :  { %p104_p4 = scmp.lt.u32.totalorder %s98_s16, %s16_s13 }
   0xb   :  { %p103_p3 = por %p102_p2, %p101_p1 }
   0xd   :  { %p105_p5 = por %p104_p4, %p103_p3 }
   0xf   :  { %p106_p6 = pnand %p105_p5, %p99_p0 }
  0x11   :  { %109 = shalt.err (!%p106_p6)
}
  0x12   :  { %s110_s22 = scalar_lea.vmem %s18_s15, 256  ;;  %p115_p8 = scmp.lt.s32.totalorder %s18_s15, %s18_s15 }
  0x13   :  { %p111_p7 = scmp.ne.s32.totalorder %s18_s15, %s110_s22  ;;  %p116_p9 = scmp.lt.s32.totalorder %s110_s22, %s110_s22 }
  0x15   :  { %p117_p10 = por %p116_p9, %p115_p8 }
  0x17   :  { %p118_p11 = pnand %p117_p10, %p111_p7 }
  0x19   :  { %121 = shalt.err (!%p118_p11)
}
  0x1a   :  { %s151_s23 = smov 128   ;;  %s152_s24 = smov 8  }
  0x1b   :  { %23 = dma.hbm_to_vmem [thread:$0]  %s16_s13, 256, %s18_s15, [#allocation3], %s151_s23, %s151_s23, %s152_s24  }
  0x1c   :  { %146 = dma.done.wait [#allocation3], 256  }
  0x1d   :  { %147 = vsyncadd [#allocation3], 4294967040  ;;  %v31_v0 = vld [vmem:[#allocation2] sm:$0xff]  ;;  %v32_v1 = vld [vmem:[#allocation2 + $0x8] sm:$0xff]  ;;  %v51_v6 = vlaneseq  ;;  %s153_s26 = smov [#allocation5]   ;;  %s67_s30 = scalar_lea.hbm %s205_s2, %s88_s10 }
  0x1e   :  { %v33_v2 = vmul.f32 %v31_v0, %v31_v0  ;;  %v34_v3 = vmul.f32 %v32_v1, %v32_v1  ;;  %v46_v12 = vld [vmem:[%s204_s1] sm:$0x1]  ;;  %s68_s27 = sshll.u32 %s153_s26, 4  ;;  %s69_s27 = int_to_ptr.vmem [resolvable:$true] %s68_s27 }
  0x1f   :  { %v52_v10 = vshrl.u32 %v51_v6, 7  ;;  %v49_v13 = vadd.f32 1.0, %v46_v12  ;;  %s122_s1 = scalar_lea.vmem %s69_s27, 256  ;;  %p127_p13 = scmp.lt.s32.totalorder %s69_s27, %s69_s27 }
  0x20   :  { %35 = vadd.xlane.f32.xlu0 %v33_v2  ;;  %p123_p12 = scmp.ne.s32.totalorder %s69_s27, %s122_s1  ;;  %p128_p0 = scmp.lt.s32.totalorder %s122_s1, %s122_s1 }
  0x21   :  { %v53_v14 = vsub.s32 0, %v52_v10 }
  0x22   :  { %p129_p1 = por %p128_p0, %p127_p13 }
  0x23   :  { %v54_v15 = vrot.slane %v49_v13, %v53_v14 }
  0x24   :  { %37 = vadd.xlane.f32.xlu0 %v34_v3  ;;  %p130_p2 = pnand %p129_p1, %p123_p12 }
  0xad   :  { %v36_v4 = vpop.xlane.xlu0 %35 }
  0xae   :  { %v40_v5 = vmul.f32 0.03125, %v36_v4 }
  0xb0   :  { %v42_v7 = vadd.f32 1e-06, %v40_v5 }
  0xb1   :  { %v38_v8 = vpop.xlane.xlu0 %37 }
  0xb2   :  { %94 = vrsqrt.f32 %v42_v7  ;;  %v41_v9 = vmul.f32 0.03125, %v38_v8 }
  0xb4   :  { %v43_v11 = vadd.f32 1e-06, %v41_v9 }
  0xb6   :  { %96 = vrsqrt.f32 %v43_v11 }
  0xbc   :  { %v95_v16 = vpop.eup %94 }
  0xbd   :  { %v47_v17 = vmul.f32 %v95_v16, %v31_v0 }
  0xbf   :  { %v56_v18 = vmul.f32 %v54_v15, %v47_v17 }
  0xc0   :  { %v97_v19 = vpop.eup %96 }
  0xc1   :  { %v48_v20 = vmul.f32 %v97_v19, %v32_v1  ;;  %58 = vst [vmem:[#allocation5] sm:$0xff] %v56_v18 }
  0xc3   :  { %v57_v21 = vmul.f32 %v54_v15, %v48_v20 }
  0xc5   :  { %59 = vst [vmem:[#allocation5 + $0x8] sm:$0xff] %v57_v21 }
  0xc6   :  { %133 = shalt.err (!%p130_p2)
}
  0xc7   :  { %s134_s3 = scalar_lea.hbm %s67_s30, 256  ;;  %s136_s6 = scalar_lea.hbm %s205_s2, 256 }
  0xc8   :  { %p135_p3 = scmp.ne.s32.totalorder %s67_s30, %s134_s3  ;;  %p137_p4 = scmp.lt.u32.totalorder %s67_s30, %s205_s2 }
  0xc9   :  { %p138_p5 = scmp.lt.u32.totalorder %s136_s6, %s134_s3  ;;  %p140_p7 = scmp.lt.u32.totalorder %s134_s3, %s67_s30 }
  0xcb   :  { %p139_p6 = por %p138_p5, %p137_p4 }
  0xcd   :  { %p141_p8 = por %p140_p7, %p139_p6 }
  0xcf   :  { %p142_p9 = pnand %p141_p8, %p135_p3 }
  0xd1   :  { %145 = shalt.err (!%p142_p9)
}
  0xd2   :  { %74 = dma.vmem_to_hbm [thread:$0]  %s69_s27, 256, %s67_s30, [#allocation4], %s151_s23, %s151_s23, %s152_s24  }
  0xd3   :  { %148 = dma.done.wait [#allocation4], 256  }
  0xd4   :  { %149 = vsyncadd [#allocation4], 4294967040 }
  0xd5   :  { %78 = vsyncpa [#allocation3], 1 }
  0xd6   :  { %79 = vsyncpa [#allocation4], 1 }

// kernel: tpu_custom_call.1
= control target key start
LH: loop header
LB: loop body
LE: loop exit
PB: predicated region body
PF: predicated region fallthrough
CT: control target
= control target key end

     0   :  { %7 = vsyncpa [#allocation3], 0  ;;  %s180_s0 = inlined_call_operand.hbm [shape: f32[16,128], index: 0, kind: input, shape index: {}]   ;;  %s181_s1 = inlined_call_operand.vmem [shape: f32[1,128], index: 1, kind: input, shape index: {}]   ;;  %s182_s2 = inlined_call_operand.hbm [shape: f32[16,128], index: 2, kind: output, shape index: {}]  }
   0x1   :  { %8 = vsyncpa [#allocation4], 0  ;;  %s128_s9 = smov [#allocation2]   ;;  %s80_s13 = scalar_lea.hbm %s180_s0, 256 }
   0x2   :  { %s14_s10 = sshll.u32 %s128_s9, 4  ;;  %p81_p0 = scmp.ne.s32.totalorder %s180_s0, %s80_s13  ;;  %s15_s10 = int_to_ptr.vmem [resolvable:$true] %s14_s10 }
   0x3   :  { %p84_p1 = scmp.lt.u32.totalorder %s80_s13, %s180_s0 }
   0x5   :  { %p86_p2 = pnand %p84_p1, %p81_p0 }
   0x7   :  { %89 = shalt.err (!%p86_p2)
}
   0x8   :  { %s90_s18 = scalar_lea.vmem %s15_s10, 256  ;;  %p95_p4 = scmp.lt.s32.totalorder %s15_s10, %s15_s10 }
   0x9   :  { %p91_p3 = scmp.ne.s32.totalorder %s15_s10, %s90_s18  ;;  %p96_p5 = scmp.lt.s32.totalorder %s90_s18, %s90_s18 }
   0xb   :  { %p97_p6 = por %p96_p5, %p95_p4 }
   0xd   :  { %p98_p7 = pnand %p97_p6, %p91_p3 }
   0xf   :  { %101 = shalt.err (!%p98_p7)
}
  0x10   :  { %s129_s19 = smov 128   ;;  %s130_s20 = smov 8  }
  0x11   :  { %20 = dma.hbm_to_vmem [thread:$0]  %s180_s0, 256, %s15_s10, [#allocation3], %s129_s19, %s129_s19, %s130_s20  }
  0x12   :  { %124 = dma.done.wait [#allocation3], 256  }
  0x13   :  { %125 = vsyncadd [#allocation3], 4294967040  ;;  %v26_v0 = vld [vmem:[#allocation2] sm:$0xff]  ;;  %v27_v1 = vld [vmem:[#allocation2 + $0x8] sm:$0xff]  ;;  %v46_v6 = vlaneseq  ;;  %s131_s0 = smov [#allocation5]  }
  0x14   :  { %v28_v2 = vmul.f32 %v26_v0, %v26_v0  ;;  %v29_v3 = vmul.f32 %v27_v1, %v27_v1  ;;  %v41_v12 = vld [vmem:[%s181_s1] sm:$0x1]  ;;  %s60_s25 = sshll.u32 %s131_s0, 4  ;;  %s61_s25 = int_to_ptr.vmem [resolvable:$true] %s60_s25 }
  0x15   :  { %v47_v10 = vshrl.u32 %v46_v6, 7  ;;  %v44_v13 = vadd.f32 1.0, %v41_v12  ;;  %s102_s26 = scalar_lea.vmem %s61_s25, 256  ;;  %p107_p9 = scmp.lt.s32.totalorder %s61_s25, %s61_s25 }
  0x16   :  { %30 = vadd.xlane.f32.xlu0 %v28_v2  ;;  %p103_p8 = scmp.ne.s32.totalorder %s61_s25, %s102_s26  ;;  %p108_p10 = scmp.lt.s32.totalorder %s102_s26, %s102_s26 }
  0x17   :  { %v48_v14 = vsub.s32 0, %v47_v10 }
  0x18   :  { %p109_p11 = por %p108_p10, %p107_p9 }
  0x19   :  { %v49_v15 = vrot.slane %v44_v13, %v48_v14 }
  0x1a   :  { %32 = vadd.xlane.f32.xlu0 %v29_v3  ;;  %p110_p12 = pnand %p109_p11, %p103_p8 }
  0xa3   :  { %v31_v4 = vpop.xlane.xlu0 %30 }
  0xa4   :  { %v35_v5 = vmul.f32 0.03125, %v31_v4 }
  0xa6   :  { %v37_v7 = vadd.f32 1e-06, %v35_v5 }
  0xa7   :  { %v33_v8 = vpop.xlane.xlu0 %32 }
  0xa8   :  { %76 = vrsqrt.f32 %v37_v7  ;;  %v36_v9 = vmul.f32 0.03125, %v33_v8 }
  0xaa   :  { %v38_v11 = vadd.f32 1e-06, %v36_v9 }
  0xac   :  { %78 = vrsqrt.f32 %v38_v11 }
  0xb2   :  { %v77_v16 = vpop.eup %76 }
  0xb3   :  { %v42_v17 = vmul.f32 %v77_v16, %v26_v0 }
  0xb5   :  { %v51_v18 = vmul.f32 %v49_v15, %v42_v17 }
  0xb6   :  { %v79_v19 = vpop.eup %78 }
  0xb7   :  { %v43_v20 = vmul.f32 %v79_v19, %v27_v1  ;;  %53 = vst [vmem:[#allocation5] sm:$0xff] %v51_v18 }
  0xb9   :  { %v52_v21 = vmul.f32 %v49_v15, %v43_v20 }
  0xbb   :  { %54 = vst [vmem:[#allocation5 + $0x8] sm:$0xff] %v52_v21 }
  0xbc   :  { %113 = shalt.err (!%p110_p12)
}
  0xbd   :  { %s114_s28 = scalar_lea.hbm %s182_s2, 256 }
  0xbe   :  { %p115_p13 = scmp.ne.s32.totalorder %s182_s2, %s114_s28  ;;  %p118_p0 = scmp.lt.u32.totalorder %s114_s28, %s182_s2 }
  0xc0   :  { %p120_p1 = pnand %p118_p0, %p115_p13 }
  0xc2   :  { %123 = shalt.err (!%p120_p1)
}
  0xc3   :  { %66 = dma.vmem_to_hbm [thread:$0]  %s61_s25, 256, %s182_s2, [#allocation4], %s129_s19, %s129_s19, %s130_s20  }
  0xc4   :  { %126 = dma.done.wait [#allocation4], 256  }
  0xc5   :  { %127 = vsyncadd [#allocation4], 4294967040 }
  0xc6   :  { %70 = vsyncpa [#allocation3], 1 }
  0xc7   :  { %71 = vsyncpa [#allocation4], 1 }

</bundles_post_ra>
